<compile_context>
chip_gen: v5e
topology: v5e:2x2
jax: 0.10.0
libtpu: 0.0.40
codegen_flags: <defaults>
</compile_context>

<pallas_src>
import functools

import jax
import jax.numpy as jnp
from jax.experimental import pallas as pl
from jax.experimental.pallas import tpu as pltpu

LANE = 128


def ensemble_kernel(x_ref, w_ref, b_ref, o_ref, *, models_per_step, c_pad, inv_m):
    """One grid step: (TB, D) @ (D, MT*Cp) logits -> per-model softmax -> accumulate."""
    j = pl.program_id(1)

    @pl.when(j == 0)
    def _init():
        o_ref[...] = jnp.zeros_like(o_ref)

    # Wide MXU pass for this model tile, f32 accumulation.
    logits = jnp.dot(x_ref[...], w_ref[...], preferred_element_type=jnp.float32)
    logits = logits + b_ref[...]          # bias is f32; padded classes carry -1e30

    acc = o_ref[...]
    # Small static unroll over the few models in this tile; each slice is a
    # lane-aligned 128-multiple so no cross-lane relayout is generated.
    for m in range(models_per_step):
        lg = logits[:, m * c_pad:(m + 1) * c_pad]
        mx = jnp.max(lg, axis=-1, keepdims=True)            # XLU
        e = jnp.exp(lg - mx)                                 # EUP
        denom = jnp.sum(e, axis=-1, keepdims=True)           # XLU
        acc = acc + e * pl.reciprocal(denom, approx=True)    # EUP vrcp (free slot)
    o_ref[...] = acc

    @pl.when(j == pl.num_programs(1) - 1)
    def _finalize():
        o_ref[...] = o_ref[...] * inv_m

    # TODO(synk): the `return_individual_accuracies` branch of the PyTorch module
    # (host-side argmax accuracy with labels + .item()) is auxiliary Python logic
    # and is intentionally not part of the kernel hot path.


def pack_ensemble_params(weights, biases):
    """One-time pre-pack (call at model init, NOT per forward call).

    (M, D, C) f32 weights -> (D, M*Cp) bf16 slab; (M, C) biases -> (1, M*Cp) f32,
    with C padded up to a lane multiple. Padded classes get bias -1e30 so their
    softmax probability is exactly 0 and they never affect the real classes.
    """
    M, D, C = weights.shape
    Cp = ((C + LANE - 1) // LANE) * LANE
    w_pad = jnp.zeros((M, D, Cp), jnp.float32).at[:, :, :C].set(
        weights.astype(jnp.float32))
    b_pad = jnp.full((M, Cp), -1e30, jnp.float32).at[:, :C].set(
        biases.astype(jnp.float32))
    w_packed = jnp.transpose(w_pad, (1, 0, 2)).reshape(D, M * Cp).astype(jnp.bfloat16)
    b_packed = b_pad.reshape(1, M * Cp)
    return w_packed, b_packed


def _pick_models_per_step(num_models, c_pad, d):
    """Largest divisor of M whose packed-N tile stays lane-friendly and VMEM-cheap."""
    best = 1
    for mt in range(1, num_models + 1):
        if num_models % mt:
            continue
        n_tile = mt * c_pad
        if n_tile <= 2048 and d * n_tile * 2 <= (2 << 20):   # bf16 weight tile <= 2 MiB
            best = mt
    return best


@functools.partial(jax.jit, static_argnames=("num_models", "num_classes"))
def ensemble_forward(x, w_packed, b_packed, *, num_models, num_classes):
    """x: (B, D) f32, pre-packed params -> averaged probabilities (B, num_classes) f32."""
    B, D = x.shape
    Cp = w_packed.shape[1] // num_models

    # Batch tiling: pad rows so B blocks are sublane-aligned; B axis is the
    # "parallel" grid axis (sharded across v7x's two TensorCores).
    B8 = -(-B // 8) * 8
    TB = min(128, B8)
    B_pad = -(-B8 // TB) * TB
    x_p = jnp.zeros((B_pad, D), jnp.bfloat16).at[:B, :].set(x.astype(jnp.bfloat16))

    MT = _pick_models_per_step(num_models, Cp, D)
    n_tile = MT * Cp
    grid = (B_pad // TB, num_models // MT)

    kernel = functools.partial(
        ensemble_kernel, models_per_step=MT, c_pad=Cp, inv_m=1.0 / num_models)

    cost = pl.CostEstimate(
        flops=2 * B_pad * D * num_models * Cp + 6 * B_pad * num_models * Cp,
        transcendentals=B_pad * num_models * Cp,
        bytes_accessed=(x_p.size * 2 + w_packed.size * 2
                        + b_packed.size * 4 + B_pad * Cp * 4),
    )

    out = pl.pallas_call(
        kernel,
        out_shape=jax.ShapeDtypeStruct((B_pad, Cp), jnp.float32),
        grid=grid,
        in_specs=[
            pl.BlockSpec((TB, D), lambda i, j: (i, 0)),         # x tile (reused over j)
            pl.BlockSpec((D, n_tile), lambda i, j: (0, j)),     # packed weight tile
            pl.BlockSpec((1, n_tile), lambda i, j: (0, j)),     # packed bias tile
        ],
        out_specs=pl.BlockSpec((TB, Cp), lambda i, j: (i, 0)),  # accumulator across j
        compiler_params=pltpu.CompilerParams(
            dimension_semantics=("parallel", "arbitrary")),
        cost_estimate=cost,
    )(x_p, w_packed, b_packed)

    return out[:B, :num_classes]


def reference_forward(x, weights, biases):
    # Same bf16-input / f32-accumulate numerics as the kernel (exact softmax).
    logits = jnp.einsum(
        "bd,mdc->mbc",
        x.astype(jnp.bfloat16),
        weights.astype(jnp.bfloat16),
        preferred_element_type=jnp.float32,
    ) + biases[:, None, :].astype(jnp.float32)
    probs = jax.nn.softmax(logits, axis=-1)
    return jnp.mean(probs, axis=0)


if __name__ == "__main__":
    # Small deterministic shapes: B=8, D=32 features, C=10 classes (exercises the
    # lane-padding path, Cp=128), M=3 ensemble members.
    B, D, C, M = 8, 32, 10, 3
    key = jax.random.PRNGKey(0)
    kx, kw, kb = jax.random.split(key, 3)

    x = jax.random.normal(kx, (B, D), dtype=jnp.float32)
    weights = jax.random.normal(kw, (M, D, C), dtype=jnp.float32) * 0.1
    biases = jax.random.normal(kb, (M, C), dtype=jnp.float32) * 0.1

    # One-time packing at "model init" — NOT in the per-call hot path.
    w_packed, b_packed = pack_ensemble_params(weights, biases)

    out = ensemble_forward(x, w_packed, b_packed, num_models=M, num_classes=C)
    out = jax.block_until_ready(out)

    ref = reference_forward(x, weights, biases)
    assert out.shape == (B, C)
    max_err = jnp.max(jnp.abs(out - ref))
    assert jnp.allclose(out, ref, atol=2e-3, rtol=2e-3), f"max abs err {max_err}"
    # Averaged probabilities still (approximately) form a distribution.
    assert jnp.allclose(jnp.sum(out, axis=-1), 1.0, atol=3e-3)

    print("KERNEL_OK")
</pallas_src>

<mosaic_0001>
module attributes {stable_mosaic.version = 11 : i64} {
  func.func @ensemble_kernel(%arg0: i32, %arg1: i32, %arg2: memref<8x32xbf16, #tpu.memory_space<vmem>>, %arg3: memref<32x384xbf16, #tpu.memory_space<vmem>>, %arg4: memref<1x384xf32, #tpu.memory_space<vmem>>, %arg5: memref<8x128xf32, #tpu.memory_space<vmem>>) attributes {dimension_semantics = [#tpu.dimension_semantics<parallel>, #tpu.dimension_semantics<arbitrary>], iteration_bounds = array<i64: 1, 1>, scalar_prefetch = 0 : i64, scratch_operands = 0 : i64, tpu.core_type = #tpu.core_type<tc>, window_params = [{transform_indices = @transform_0, window_bounds = array<i64: 8, 32>}, {transform_indices = @transform_1, window_bounds = array<i64: 32, 384>}, {transform_indices = @transform_2, window_bounds = array<i64: 1, 384>}, {transform_indices = @transform_3, window_bounds = array<i64: 8, 128>}]} {
    %c0_i32 = arith.constant 0 : i32
    %0 = arith.cmpi eq, %arg1, %c0_i32 : i32
    %1 = arith.extui %0 : i1 to i32
    %c0_i32_0 = arith.constant 0 : i32
    %2 = arith.cmpi ne, %1, %c0_i32_0 : i32
    scf.if %2 {
      %cst_18 = arith.constant 0.000000e+00 : f32
      %50 = vector.broadcast %cst_18 : f32 to vector<8x128xf32>
      %c0_19 = arith.constant 0 : index
      %c0_20 = arith.constant 0 : index
      %51 = vector.load %arg5[%c0_19, %c0_20] : memref<8x128xf32, #tpu.memory_space<vmem>>, vector<8x128xf32>
      tpu.vector_store %arg5[%c0_19, %c0_20], %50 {strides = array<i32>} : memref<8x128xf32, #tpu.memory_space<vmem>>, vector<8x128xf32>,
    } else {
    }
    %c0 = arith.constant 0 : index
    %c0_1 = arith.constant 0 : index
    %3 = vector.load %arg2[%c0, %c0_1] : memref<8x32xbf16, #tpu.memory_space<vmem>>, vector<8x32xbf16>
    %c0_2 = arith.constant 0 : index
    %c0_3 = arith.constant 0 : index
    %4 = vector.load %arg3[%c0_2, %c0_3] : memref<32x384xbf16, #tpu.memory_space<vmem>>, vector<32x384xbf16>
    %cst = arith.constant dense<0.000000e+00> : vector<8x384xf32>
    %5 = tpu.matmul %3, %4, %cst {dimension_numbers = #tpu.dot_dimension_numbers<[1], [0], [0], [1], [0, 0, 1, 1], [], []>} : vector<8x32xbf16>, vector<32x384xbf16>, vector<8x384xf32> -> vector<8x384xf32>
    %c0_4 = arith.constant 0 : index
    %c0_5 = arith.constant 0 : index
    %6 = vector.load %arg4[%c0_4, %c0_5] : memref<1x384xf32, #tpu.memory_space<vmem>>, vector<1x384xf32>
    %7 = vector.broadcast %6 : vector<1x384xf32> to vector<8x384xf32>
    %8 = arith.addf %5, %7 : vector<8x384xf32>
    %c0_6 = arith.constant 0 : index
    %c0_7 = arith.constant 0 : index
    %9 = vector.load %arg5[%c0_6, %c0_7] : memref<8x128xf32, #tpu.memory_space<vmem>>, vector<8x128xf32>
    %10 = vector.extract_strided_slice %8 {offsets = [0, 0], sizes = [8, 128], strides = [1, 1]} : vector<8x384xf32> to vector<8x128xf32>
    %cst_8 = arith.constant dense<0xFF800000> : vector<8xf32>
    %11 = vector.multi_reduction <maximumf>, %10, %cst_8 [1] : vector<8x128xf32> to vector<8xf32>
    %12 = vector.shape_cast %11 : vector<8xf32> to vector<8x1xf32>
    %13 = vector.broadcast %12 : vector<8x1xf32> to vector<8x128xf32>
    %14 = arith.subf %10, %13 : vector<8x128xf32>
    %15 = math.exp %14 : vector<8x128xf32>
    %cst_9 = arith.constant dense<0.000000e+00> : vector<8xf32>
    %16 = vector.multi_reduction <add>, %15, %cst_9 [1] : vector<8x128xf32> to vector<8xf32>
    %17 = vector.shape_cast %16 : vector<8xf32> to vector<8x1xf32>
    %18 = tpu.reciprocal %17 {approx = true} : vector<8x1xf32> -> vector<8x1xf32>
    %19 = vector.broadcast %18 : vector<8x1xf32> to vector<8x128xf32>
    %20 = arith.mulf %15, %19 : vector<8x128xf32>
    %21 = arith.addf %9, %20 : vector<8x128xf32>
    %22 = vector.extract_strided_slice %8 {offsets = [0, 128], sizes = [8, 128], strides = [1, 1]} : vector<8x384xf32> to vector<8x128xf32>
    %cst_10 = arith.constant dense<0xFF800000> : vector<8xf32>
    %23 = vector.multi_reduction <maximumf>, %22, %cst_10 [1] : vector<8x128xf32> to vector<8xf32>
    %24 = vector.shape_cast %23 : vector<8xf32> to vector<8x1xf32>
    %25 = vector.broadcast %24 : vector<8x1xf32> to vector<8x128xf32>
    %26 = arith.subf %22, %25 : vector<8x128xf32>
    %27 = math.exp %26 : vector<8x128xf32>
    %cst_11 = arith.constant dense<0.000000e+00> : vector<8xf32>
    %28 = vector.multi_reduction <add>, %27, %cst_11 [1] : vector<8x128xf32> to vector<8xf32>
    %29 = vector.shape_cast %28 : vector<8xf32> to vector<8x1xf32>
    %30 = tpu.reciprocal %29 {approx = true} : vector<8x1xf32> -> vector<8x1xf32>
    %31 = vector.broadcast %30 : vector<8x1xf32> to vector<8x128xf32>
    %32 = arith.mulf %27, %31 : vector<8x128xf32>
    %33 = arith.addf %21, %32 : vector<8x128xf32>
    %34 = vector.extract_strided_slice %8 {offsets = [0, 256], sizes = [8, 128], strides = [1, 1]} : vector<8x384xf32> to vector<8x128xf32>
    %cst_12 = arith.constant dense<0xFF800000> : vector<8xf32>
    %35 = vector.multi_reduction <maximumf>, %34, %cst_12 [1] : vector<8x128xf32> to vector<8xf32>
    %36 = vector.shape_cast %35 : vector<8xf32> to vector<8x1xf32>
    %37 = vector.broadcast %36 : vector<8x1xf32> to vector<8x128xf32>
    %38 = arith.subf %34, %37 : vector<8x128xf32>
    %39 = math.exp %38 : vector<8x128xf32>
    %cst_13 = arith.constant dense<0.000000e+00> : vector<8xf32>
    %40 = vector.multi_reduction <add>, %39, %cst_13 [1] : vector<8x128xf32> to vector<8xf32>
    %41 = vector.shape_cast %40 : vector<8xf32> to vector<8x1xf32>
    %42 = tpu.reciprocal %41 {approx = true} : vector<8x1xf32> -> vector<8x1xf32>
    %43 = vector.broadcast %42 : vector<8x1xf32> to vector<8x128xf32>
    %44 = arith.mulf %39, %43 : vector<8x128xf32>
    %45 = arith.addf %33, %44 : vector<8x128xf32>
    %c0_14 = arith.constant 0 : index
    %c0_15 = arith.constant 0 : index
    %46 = vector.load %arg5[%c0_14, %c0_15] : memref<8x128xf32, #tpu.memory_space<vmem>>, vector<8x128xf32>
    tpu.vector_store %arg5[%c0_14, %c0_15], %45 {strides = array<i32>} : memref<8x128xf32, #tpu.memory_space<vmem>>, vector<8x128xf32>,
    %c0_i32_16 = arith.constant 0 : i32
    %47 = arith.cmpi eq, %arg1, %c0_i32_16 : i32
    %48 = arith.extui %47 : i1 to i32
    %c0_i32_17 = arith.constant 0 : i32
    %49 = arith.cmpi ne, %48, %c0_i32_17 : i32
    scf.if %49 {
      %c0_18 = arith.constant 0 : index
      %c0_19 = arith.constant 0 : index
      %50 = vector.load %arg5[%c0_18, %c0_19] : memref<8x128xf32, #tpu.memory_space<vmem>>, vector<8x128xf32>
      %cst_20 = arith.constant 0.333333343 : f32
      %51 = vector.broadcast %cst_20 : f32 to vector<8x128xf32>
      %52 = arith.mulf %50, %51 : vector<8x128xf32>
      %c0_21 = arith.constant 0 : index
      %c0_22 = arith.constant 0 : index
      %53 = vector.load %arg5[%c0_21, %c0_22] : memref<8x128xf32, #tpu.memory_space<vmem>>, vector<8x128xf32>
      tpu.vector_store %arg5[%c0_21, %c0_22], %52 {strides = array<i32>} : memref<8x128xf32, #tpu.memory_space<vmem>>, vector<8x128xf32>,
    } else {
    }
    return
  }
  func.func @transform_0(%arg0: i32, %arg1: i32) -> (i32, i32) {
    %c0_i32 = arith.constant 0 : i32
    %c0_i32_0 = arith.constant 0 : i32
    return %arg0, %c0_i32 : i32, i32
  }
  func.func @transform_1(%arg0: i32, %arg1: i32) -> (i32, i32) {
    %c0_i32 = arith.constant 0 : i32
    %c0_i32_0 = arith.constant 0 : i32
    return %c0_i32, %arg1 : i32, i32
  }
  func.func @transform_2(%arg0: i32, %arg1: i32) -> (i32, i32) {
    %c0_i32 = arith.constant 0 : i32
    %c0_i32_0 = arith.constant 0 : i32
    return %c0_i32, %arg1 : i32, i32
  }
  func.func @transform_3(%arg0: i32, %arg1: i32) -> (i32, i32) {
    %c0_i32 = arith.constant 0 : i32
    %c0_i32_0 = arith.constant 0 : i32
    return %arg0, %c0_i32 : i32, i32
  }
}

</mosaic_0001>

<bundles_post_ra>
// kernel: ensemble_forward.1
= control target key start
LH: loop header
LB: loop body
LE: loop exit
PB: predicated region body
PF: predicated region fallthrough
CT: control target
= control target key end

     0   :  { %8 = vsyncpa [#allocation3], 0  ;;  %s322_s0 = inlined_call_operand.vmem [shape: bf16[8,32], index: 0, kind: input, shape index: {}]   ;;  %s323_s1 = inlined_call_operand.hbm [shape: bf16[32,384], index: 1, kind: input, shape index: {}]   ;;  %s324_s2 = inlined_call_operand.vmem [shape: f32[1,384], index: 2, kind: input, shape index: {}]   ;;  %s325_s3 = inlined_call_operand.hbm [shape: f32[8,128], index: 3, kind: output, shape index: {}]  }
   0x1   :  { %9 = vsyncpa [#allocation4], 0  ;;  %s16_s14 = sshll.u32 %s323_s1, 4  ;;  %s286_s15 = smov [#allocation2]   ;;  %s17_s14 = int_to_ptr.hbm [resolvable:$true] %s16_s14 }
   0x2   :  { %s18_s16 = sshll.u32 %s286_s15, 4  ;;  %s287_s17 = smov 192   ;;  %s19_s16 = int_to_ptr.vmem [resolvable:$true] %s18_s16 }
   0x3   :  { %s288_s18 = smov 12  }
   0x4   :  { %24 = dma.hbm_to_vmem [thread:$0]  %s17_s14, 768, %s19_s16, [#allocation3], %s287_s17, %s287_s17, %s288_s18  }
   0x5   :  { %282 = dma.done.wait [#allocation3], 768  }
   0x6   :  { %283 = vsyncadd [#allocation3], 4294966528  ;;  %v198_v0 = vld [vmem:[#allocation2 + $0x18] sm:$0xf]  ;;  %v215_v1 = vld [vmem:[#allocation2 + $0x20] sm:$0xf0] }
   0x7   :  { %v214_v2 = vld [vmem:[#allocation2 + $0x1c] sm:$0xf]  ;;  %v199_v3 = vor.u32 %v215_v1, %v198_v0  ;;  %v200_v4 = vld [vmem:[#allocation2 + $0x24] sm:$0xf0]  ;;  %v206_v5 = vld [vmem:[#allocation2 + $0x20] sm:$0xf] }
   0x8   :  { %v216_v6 = vld [vmem:[#allocation2 + $0x28] sm:$0xf0]  ;;  %v203_v7 = vor.u32 %v214_v2, %v200_v4  ;;  %v186_v9 = vld [vmem:[#allocation2] sm:$0xf]  ;;  %v211_v11 = vld [vmem:[#allocation2 + $0x4] sm:$0xf] }
   0x9   :  { %v207_v8 = vor.u32 %v216_v6, %v206_v5  ;;  %v212_v10 = vld [vmem:[#allocation2 + $0x8] sm:$0xf0]  ;;  %96 = vmatpush.bf16.msra.mxu0 %v199_v3  ;;  %v188_v13 = vld [vmem:[#allocation2 + $0xc] sm:$0xf0]  ;;  %v194_v14 = vld [vmem:[#allocation2 + $0x8] sm:$0xf] }
   0xa   :  { %v187_v12 = vor.u32 %v212_v10, %v186_v9  ;;  %v213_v15 = vld [vmem:[#allocation2 + $0x10] sm:$0xf0]  ;;  %109 = vmatpush.bf16.msra.mxu1 %v203_v7  ;;  %v191_v16 = vor.u32 %v211_v11, %v188_v13  ;;  %v37_v18 = vld [vmem:[%s322_s0] sm:$0xf]  ;;  %vm86_vm0 = vcmask 261120   ;;  %s289_s0 = smov [#allocation5]  }
   0xb   :  { %122 = vmatpush.bf16.msra.mxu2 %v207_v8  ;;  %v195_v17 = vor.u32 %v213_v15, %v194_v14  ;;  %v46_v19 = vld [vmem:[%s324_s2] sm:$0x7]  ;;  %s172_s2 = sshll.u32 %s289_s0, 4  ;;  %s174_s24 = sshll.u32 %s325_s3, 4  ;;  %s173_s2 = int_to_ptr.vmem [resolvable:$true] %s172_s2  ;;  %s175_s24 = int_to_ptr.hbm [resolvable:$true] %s174_s24 }
   0xc   :  { %v48_v20 = vperm.slane %v46_v19, 0  ;;  %v49_v24 = vperm.slane %v46_v19, 1  ;;  %v50_v25 = vperm.slane %v46_v19, 2 }
   0xd   :  { %97 = vmatpush.bf16.msra.mxu0 %v187_v12 }
   0xe   :  { %110 = vmatpush.bf16.msra.mxu1 %v191_v16 }
   0xf   :  { %123 = vmatpush.bf16.msra.mxu2 %v195_v17 }
  0x10   :  { %208 = vmatmul.msk.bf16.vlgmr.msra.gmra.mxu0 %vm86_vm0, %v37_v18 }
  0x11   :  { %209 = vmatmul.msk.bf16.vlgmr.msra.gmra.mxu1 %vm86_vm0, %v37_v18 }
  0x12   :  { %210 = vmatmul.msk.bf16.vlgmr.msra.gmra.mxu2 %vm86_vm0, %v37_v18 }
  0x8d   :  { %v99_v21 = vpop.f32.mrf.mxu0 }
  0x8e   :  { %v100_v22 = vadd.f32 %v99_v21, %v48_v20  ;;  %v112_v23 = vpop.f32.mrf.mxu1 }
  0x8f   :  { %v113_v26 = vadd.f32 %v112_v23, %v49_v24 }
  0x90   :  { %130 = vmax.xlane.f32.xlu0 %v100_v22 }
  0x95   :  { %v125_v27 = vpop.f32.mrf.mxu2  ;;  %v101_v29 = vpop.f32.mrf.mxu0 }
  0x96   :  { %v126_v28 = vadd.f32 %v125_v27, %v50_v25  ;;  %v114_v30 = vpop.f32.mrf.mxu1 }
  0x98   :  { %150 = vmax.xlane.f32.xlu1 %v126_v28  ;;  %140 = vmax.xlane.f32.xlu0 %v113_v26 }
  0x9d   :  { %v127_v31 = vpop.f32.mrf.mxu2 }
 0x103   :  { %v131_v32 = vpop.xlane.xlu0 %130 }
 0x104   :  { %v132_v33 = vsub.f32 %v100_v22, %v131_v32 }
 0x106   :  { %v133_v34 = vmul.f32 1.442695, %v132_v33 }
 0x108   :  { %222 = vpow2.f32 %v133_v34 }
 0x10b   :  { %v141_v35 = vpop.xlane.xlu0 %140  ;;  %v151_v37 = vpop.xlane.xlu1 %150 }
 0x10c   :  { %v142_v36 = vsub.f32 %v113_v26, %v141_v35  ;;  %v152_v40 = vsub.f32 %v126_v28, %v151_v37 }
 0x10e   :  { %v223_v38 = vpop.eup %222  ;;  %v143_v39 = vmul.f32 1.442695, %v142_v36  ;;  %v153_v41 = vmul.f32 1.442695, %v152_v40 }
 0x10f   :  { %135 = vadd.xlane.f32.xlu1 %v223_v38 }
 0x110   :  { %224 = vpow2.f32 %v143_v39 }
 0x111   :  { %226 = vpow2.f32 %v153_v41 }
 0x116   :  { %v225_v42 = vpop.eup %224 }
 0x117   :  { %145 = vadd.xlane.f32.xlu2 %v225_v42  ;;  %v227_v43 = vpop.eup %226 }
 0x11f   :  { %155 = vadd.xlane.f32.xlu2 %v227_v43 }
 0x182   :  { %v136_v44 = vpop.xlane.xlu1 %135 }
 0x183   :  { %228 = vrcp.f32 %v136_v44 }
 0x189   :  { %v229_v46 = vpop.eup %228 }
 0x18a   :  { %v146_v45 = vpop.xlane.xlu2 %145  ;;  %v138_v49 = vmul.f32 %v229_v46, %v223_v38 }
 0x18b   :  { %230 = vrcp.f32 %v146_v45 }
 0x191   :  { %v231_v48 = vpop.eup %230 }
 0x192   :  { %v156_v47 = vpop.xlane.xlu2 %155  ;;  %v148_v50 = vmul.f32 %v231_v48, %v225_v42 }
 0x193   :  { %232 = vrcp.f32 %v156_v47 }
 0x194   :  { %v149_v52 = vadd.f32 %v148_v50, %v138_v49 }
 0x199   :  { %v233_v51 = vpop.eup %232 }
 0x19a   :  { %v158_v53 = vmul.f32 %v233_v51, %v227_v43 }
 0x19c   :  { %v159_v54 = vadd.f32 %v158_v53, %v149_v52 }
 0x19e   :  { %v165_v55 = vmul.f32 0.33333334, %v159_v54 }
 0x1a0   :  { %166 = vst [vmem:[#allocation5] sm:$0xff] %v165_v55 }
 0x1a1   :  { %177 = dma.vmem_to_hbm [thread:$0]  %s173_s2, 128, %s175_s24, [#allocation4]  }
 0x1a2   :  { %284 = dma.done.wait [#allocation4], 128  }
 0x1a3   :  { %285 = vsyncadd [#allocation4], 4294967168 }
 0x1a4   :  { %182 = vsyncpa [#allocation3], 1 }
 0x1a5   :  { %183 = vsyncpa [#allocation4], 1 }

</bundles_post_ra>
